<compile_context>
chip_gen: v6e
topology: v6e:2x2x1
jax: 0.10.0
libtpu: 0.0.40
codegen_flags: <defaults>
</compile_context>

<pallas_src>
import functools

import jax
import jax.numpy as jnp
from jax import lax
from jax.experimental import pallas as pl
from jax.experimental.pallas import tpu as pltpu

_MIB = 1024 * 1024


def _round_up(x: int, m: int) -> int:
    return ((x + m - 1) // m) * m


def _vmem_budget_bytes() -> int:
    """Per-generation VMEM budget: ~80% of physical per-core VMEM, capped."""
    try:
        cap = pltpu.get_tpu_info().vmem_capacity_bytes
    except Exception:
        cap = 64 * _MIB  # conservative fallback (v7x-sized, 64 MiB / TC)
    # ~51 MiB on v7x (64 MiB/TC), ~102 MiB on v5e/v6e (128 MiB), capped at 112 MiB.
    return min(int(cap * 0.8), 112 * _MIB)


def _flash_attn_kernel(xq_ref, wq_ref, k_ref, v_ref, o_ref,
                       q_sc, m_sc, l_sc, acc_sc, *, scale, n_keys):
    """One (q-tile, k-tile) grid step of flash-style self-attention.

    xq_ref : (TQ, d_in)    query rows of zero-padded x   [resident over k axis]
    wq_ref : (d_in, d_out) query projection weight       [resident]
    k_ref  : (TK, d_out)   pre-projected keys tile       (streamed from HBM)
    v_ref  : (TK, d_out)   pre-projected values tile     (streamed from HBM)
    o_ref  : (TQ, d_out)   context tile (written on the last k step)
    q_sc/m_sc/l_sc/acc_sc : per-q-tile online-softmax VMEM scratch
    """
    kj = pl.program_id(1)

    @pl.when(kj == 0)
    def _init():
        # Hoisted Q projection: once per q-tile, not per k step.
        q_sc[...] = (
            jnp.dot(xq_ref[...], wq_ref[...], preferred_element_type=jnp.float32)
            * scale
        )
        m_sc[...] = jnp.full(m_sc.shape, -jnp.inf, jnp.float32)
        l_sc[...] = jnp.zeros(l_sc.shape, jnp.float32)
        acc_sc[...] = jnp.zeros(acc_sc.shape, jnp.float32)

    # Scores for this K tile: contract last dims directly (no k.T / XLU transpose).
    s = lax.dot_general(
        q_sc[...], k_ref[...], (((1,), (1,)), ((), ())),
        preferred_element_type=jnp.float32,
    )  # (TQ, TK)

    # Mask zero-padded KEY rows (they would otherwise corrupt the softmax);
    # padded QUERY rows only produce garbage that the wrapper slices off.
    tk = k_ref.shape[0]
    key_idx = kj * tk + lax.broadcasted_iota(jnp.int32, s.shape, 1)
    s = jnp.where(key_idx < n_keys, s, -1e30)

    # Online-softmax update.
    m_prev = m_sc[...]
    m_new = jnp.maximum(m_prev, jnp.max(s, axis=-1, keepdims=True))
    alpha = jnp.exp(m_prev - m_new)
    p = jnp.exp(s - m_new)
    l_sc[...] = alpha * l_sc[...] + jnp.sum(p, axis=-1, keepdims=True)
    acc_sc[...] = alpha * acc_sc[...] + jnp.dot(
        p, v_ref[...], preferred_element_type=jnp.float32
    )
    m_sc[...] = m_new

    @pl.when(kj == pl.num_programs(1) - 1)
    def _finalize():
        o_ref[...] = (
            acc_sc[...] * pl.reciprocal(l_sc[...], approx=False)
        ).astype(o_ref.dtype)


def self_attention_v1(x, w_query, w_key, w_value, *, q_tile=None, k_tile=None):
    """Pallas wrapper matching SelfAttentionV1.forward semantics.

    x: (N, d_in) float32; w_query/w_key/w_value: (d_in, d_out); -> (N, d_out).
    """
    n, d_in = x.shape
    d_out = w_query.shape[1]

    x = x.astype(jnp.float32)
    w_query = w_query.astype(jnp.float32)

    vmem_limit = _vmem_budget_bytes()
    if q_tile is None:
        # Smaller default q-tile on v7x-sized (<=64 MiB) VMEM, larger on v5e/v6e.
        q_tile = 256 if vmem_limit <= 64 * _MIB else 512
    if k_tile is None:
        k_tile = 512

    # K/V projections hoisted out of the kernel entirely (one XLA dot each):
    # never recomputed per q-tile, streamed tile-by-tile into the flash loop.
    keys = x @ w_key.astype(jnp.float32)      # (n, d_out)
    values = x @ w_value.astype(jnp.float32)  # (n, d_out)

    tq = min(q_tile, _round_up(n, 8))
    tk = min(k_tile, _round_up(n, 8))
    nq_pad = _round_up(n, tq)
    nk_pad = _round_up(n, tk)

    x_q = jnp.pad(x, ((0, nq_pad - n), (0, 0)))
    keys = jnp.pad(keys, ((0, nk_pad - n), (0, 0)))
    values = jnp.pad(values, ((0, nk_pad - n), (0, 0)))

    grid = (nq_pad // tq, nk_pad // tk)          # reduction (k) axis last
    scale = 1.0 / float(d_out) ** 0.5            # keys.shape[-1] ** 0.5

    out_padded = pl.pallas_call(
        functools.partial(_flash_attn_kernel, scale=scale, n_keys=n),
        out_shape=jax.ShapeDtypeStruct((nq_pad, d_out), jnp.float32),
        grid=grid,
        in_specs=[
            pl.BlockSpec((tq, d_in), lambda qi, kj: (qi, 0)),     # query rows
            pl.BlockSpec((d_in, d_out), lambda qi, kj: (0, 0)),   # Wq (resident)
            pl.BlockSpec((tk, d_out), lambda qi, kj: (kj, 0)),    # K tile
            pl.BlockSpec((tk, d_out), lambda qi, kj: (kj, 0)),    # V tile
        ],
        out_specs=pl.BlockSpec((tq, d_out), lambda qi, kj: (qi, 0)),
        scratch_shapes=[
            pltpu.VMEM((tq, d_out), jnp.float32),  # q (hoisted projection)
            pltpu.VMEM((tq, 1), jnp.float32),      # running max m
            pltpu.VMEM((tq, 1), jnp.float32),      # running denom l
            pltpu.VMEM((tq, d_out), jnp.float32),  # context accumulator
        ],
        compiler_params=pltpu.CompilerParams(
            dimension_semantics=("parallel", "arbitrary"),
            vmem_limit_bytes=vmem_limit,
        ),
    )(x_q, w_query, keys, values)

    # Strip padded query rows (output last dim is already exactly d_out).
    return out_padded[:n, :]


def _reference(x, w_query, w_key, w_value):
    """Pure-JAX reference mirroring the PyTorch module exactly."""
    keys = x @ w_key
    queries = x @ w_query
    values = x @ w_value
    attn_scores = queries @ keys.T
    attn_weights = jax.nn.softmax(attn_scores / keys.shape[-1] ** 0.5, axis=-1)
    return attn_weights @ values


if __name__ == "__main__":
    # Shapes from the spec: 6 tokens, d_in=3, d_out=2.
    inputs = jnp.array(
        [[0.43, 0.15, 0.89],
         [0.55, 0.87, 0.66],
         [0.57, 0.85, 0.64],
         [0.22, 0.58, 0.33],
         [0.77, 0.25, 0.10],
         [0.05, 0.80, 0.55]],
        dtype=jnp.float32,
    )
    d_in = inputs.shape[1]
    d_out = 2

    # Deterministic parameter init (torch.rand -> uniform[0,1)).
    key = jax.random.PRNGKey(0)
    kq, kk, kv = jax.random.split(key, 3)
    w_query = jax.random.uniform(kq, (d_in, d_out), dtype=jnp.float32)
    w_key = jax.random.uniform(kk, (d_in, d_out), dtype=jnp.float32)
    w_value = jax.random.uniform(kv, (d_in, d_out), dtype=jnp.float32)

    out = jax.block_until_ready(self_attention_v1(inputs, w_query, w_key, w_value))
    ref = _reference(inputs, w_query, w_key, w_value)
    assert out.shape == (inputs.shape[0], d_out), out.shape
    assert jnp.allclose(out, ref, atol=1e-5, rtol=1e-5), (out, ref)

    # Second check: multi-tile grid (3 q-tiles x 3 k-tiles) with a ragged last
    # key tile — exercises the online-softmax carry and the key-padding mask.
    n2, d_in2, d_out2 = 20, 8, 8
    k2 = jax.random.PRNGKey(1)
    kx, kq2, kk2, kv2 = jax.random.split(k2, 4)
    x2 = jax.random.uniform(kx, (n2, d_in2), dtype=jnp.float32)
    wq2 = jax.random.uniform(kq2, (d_in2, d_out2), dtype=jnp.float32)
    wk2 = jax.random.uniform(kk2, (d_in2, d_out2), dtype=jnp.float32)
    wv2 = jax.random.uniform(kv2, (d_in2, d_out2), dtype=jnp.float32)
    out2 = jax.block_until_ready(
        self_attention_v1(x2, wq2, wk2, wv2, q_tile=8, k_tile=8))
    ref2 = _reference(x2, wq2, wk2, wv2)
    assert out2.shape == (n2, d_out2), out2.shape
    assert jnp.allclose(out2, ref2, atol=1e-4, rtol=1e-4), (out2, ref2)

    print("KERNEL_OK")
</pallas_src>

<mosaic_0001>
module attributes {stable_mosaic.version = 11 : i64} {
  func.func @_flash_attn_kernel(%arg0: i32, %arg1: i32, %arg2: memref<8x3xf32, #tpu.memory_space<vmem>>, %arg3: memref<3x2xf32, #tpu.memory_space<vmem>>, %arg4: memref<8x2xf32, #tpu.memory_space<vmem>>, %arg5: memref<8x2xf32, #tpu.memory_space<vmem>>, %arg6: memref<8x2xf32, #tpu.memory_space<vmem>>, %arg7: memref<8x2xf32, #tpu.memory_space<vmem>>, %arg8: memref<8x1xf32, #tpu.memory_space<vmem>>, %arg9: memref<8x1xf32, #tpu.memory_space<vmem>>, %arg10: memref<8x2xf32, #tpu.memory_space<vmem>>) attributes {dimension_semantics = [#tpu.dimension_semantics<parallel>, #tpu.dimension_semantics<arbitrary>], iteration_bounds = array<i64: 1, 1>, scalar_prefetch = 0 : i64, scratch_operands = 4 : i64, tpu.core_type = #tpu.core_type<tc>, window_params = [{transform_indices = @transform_0, window_bounds = array<i64: 8, 3>}, {pipeline_mode = #tpu.pipeline_mode<synchronous>, transform_indices = @transform_1, window_bounds = array<i64: 3, 2>}, {transform_indices = @transform_2, window_bounds = array<i64: 8, 2>}, {transform_indices = @transform_3, window_bounds = array<i64: 8, 2>}, {transform_indices = @transform_4, window_bounds = array<i64: 8, 2>}]} {
    %c0_i32 = arith.constant 0 : i32
    %0 = arith.cmpi eq, %arg1, %c0_i32 : i32
    %1 = arith.extui %0 : i1 to i32
    %c0_i32_0 = arith.constant 0 : i32
    %2 = arith.cmpi ne, %1, %c0_i32_0 : i32
    scf.if %2 {
      %c0_24 = arith.constant 0 : index
      %c0_25 = arith.constant 0 : index
      %40 = vector.load %arg2[%c0_24, %c0_25] : memref<8x3xf32, #tpu.memory_space<vmem>>, vector<8x3xf32>
      %c0_26 = arith.constant 0 : index
      %c0_27 = arith.constant 0 : index
      %41 = vector.load %arg3[%c0_26, %c0_27] : memref<3x2xf32, #tpu.memory_space<vmem>>, vector<3x2xf32>
      %cst_28 = arith.constant dense<0.000000e+00> : vector<8x2xf32>
      %42 = tpu.matmul %40, %41, %cst_28 {dimension_numbers = #tpu.dot_dimension_numbers<[1], [0], [0], [1], [0, 0, 1, 1], [], []>} : vector<8x3xf32>, vector<3x2xf32>, vector<8x2xf32> -> vector<8x2xf32>
      %cst_29 = arith.constant 0.707106769 : f32
      %43 = vector.broadcast %cst_29 : f32 to vector<8x2xf32>
      %44 = arith.mulf %42, %43 : vector<8x2xf32>
      %c0_30 = arith.constant 0 : index
      %c0_31 = arith.constant 0 : index
      %45 = vector.load %arg7[%c0_30, %c0_31] : memref<8x2xf32, #tpu.memory_space<vmem>>, vector<8x2xf32>
      tpu.vector_store %arg7[%c0_30, %c0_31], %44 {strides = array<i32>} : memref<8x2xf32, #tpu.memory_space<vmem>>, vector<8x2xf32>,
      %cst_32 = arith.constant 0xFF800000 : f32
      %46 = vector.broadcast %cst_32 : f32 to vector<8x1xf32>
      %c0_33 = arith.constant 0 : index
      %c0_34 = arith.constant 0 : index
      %47 = vector.load %arg8[%c0_33, %c0_34] : memref<8x1xf32, #tpu.memory_space<vmem>>, vector<8x1xf32>
      tpu.vector_store %arg8[%c0_33, %c0_34], %46 {strides = array<i32>} : memref<8x1xf32, #tpu.memory_space<vmem>>, vector<8x1xf32>,
      %cst_35 = arith.constant 0.000000e+00 : f32
      %48 = vector.broadcast %cst_35 : f32 to vector<8x1xf32>
      %c0_36 = arith.constant 0 : index
      %c0_37 = arith.constant 0 : index
      %49 = vector.load %arg9[%c0_36, %c0_37] : memref<8x1xf32, #tpu.memory_space<vmem>>, vector<8x1xf32>
      tpu.vector_store %arg9[%c0_36, %c0_37], %48 {strides = array<i32>} : memref<8x1xf32, #tpu.memory_space<vmem>>, vector<8x1xf32>,
      %cst_38 = arith.constant 0.000000e+00 : f32
      %50 = vector.broadcast %cst_38 : f32 to vector<8x2xf32>
      %c0_39 = arith.constant 0 : index
      %c0_40 = arith.constant 0 : index
      %51 = vector.load %arg10[%c0_39, %c0_40] : memref<8x2xf32, #tpu.memory_space<vmem>>, vector<8x2xf32>
      tpu.vector_store %arg10[%c0_39, %c0_40], %50 {strides = array<i32>} : memref<8x2xf32, #tpu.memory_space<vmem>>, vector<8x2xf32>,
    } else {
    }
    %c0 = arith.constant 0 : index
    %c0_1 = arith.constant 0 : index
    %3 = vector.load %arg7[%c0, %c0_1] : memref<8x2xf32, #tpu.memory_space<vmem>>, vector<8x2xf32>
    %c0_2 = arith.constant 0 : index
    %c0_3 = arith.constant 0 : index
    %4 = vector.load %arg4[%c0_2, %c0_3] : memref<8x2xf32, #tpu.memory_space<vmem>>, vector<8x2xf32>
    %cst = arith.constant dense<0.000000e+00> : vector<8x8xf32>
    %5 = tpu.matmul %3, %4, %cst {dimension_numbers = #tpu.dot_dimension_numbers<[1], [1], [0], [0], [0, 0, 1, 0], [], []>} : vector<8x2xf32>, vector<8x2xf32>, vector<8x8xf32> -> vector<8x8xf32>
    %c8_i32 = arith.constant 8 : i32
    %6 = arith.muli %arg1, %c8_i32 : i32
    %7 = tpu.iota {dimensions = array<i32: 1>} : vector<8x8xi32>
    %8 = vector.broadcast %6 : i32 to vector<8x8xi32>
    %9 = arith.addi %8, %7 : vector<8x8xi32>
    %c6_i32 = arith.constant 6 : i32
    %10 = vector.broadcast %c6_i32 : i32 to vector<8x8xi32>
    %11 = arith.cmpi slt, %9, %10 : vector<8x8xi32>
    %cst_4 = arith.constant -1.000000e+30 : f32
    %12 = vector.broadcast %cst_4 : f32 to vector<8x8xf32>
    %13 = arith.select %11, %5, %12 : vector<8x8xi1>, vector<8x8xf32>
    %c0_5 = arith.constant 0 : index
    %c0_6 = arith.constant 0 : index
    %14 = vector.load %arg8[%c0_5, %c0_6] : memref<8x1xf32, #tpu.memory_space<vmem>>, vector<8x1xf32>
    %cst_7 = arith.constant dense<0xFF800000> : vector<8xf32>
    %15 = vector.multi_reduction <maximumf>, %13, %cst_7 [1] : vector<8x8xf32> to vector<8xf32>
    %16 = vector.shape_cast %15 : vector<8xf32> to vector<8x1xf32>
    %17 = arith.maximumf %14, %16 : vector<8x1xf32>
    %18 = arith.subf %14, %17 : vector<8x1xf32>
    %19 = math.exp %18 : vector<8x1xf32>
    %20 = vector.broadcast %17 : vector<8x1xf32> to vector<8x8xf32>
    %21 = arith.subf %13, %20 : vector<8x8xf32>
    %22 = math.exp %21 : vector<8x8xf32>
    %c0_8 = arith.constant 0 : index
    %c0_9 = arith.constant 0 : index
    %23 = vector.load %arg9[%c0_8, %c0_9] : memref<8x1xf32, #tpu.memory_space<vmem>>, vector<8x1xf32>
    %24 = arith.mulf %19, %23 : vector<8x1xf32>
    %cst_10 = arith.constant dense<0.000000e+00> : vector<8xf32>
    %25 = vector.multi_reduction <add>, %22, %cst_10 [1] : vector<8x8xf32> to vector<8xf32>
    %26 = vector.shape_cast %25 : vector<8xf32> to vector<8x1xf32>
    %27 = arith.addf %24, %26 : vector<8x1xf32>
    %c0_11 = arith.constant 0 : index
    %c0_12 = arith.constant 0 : index
    %28 = vector.load %arg9[%c0_11, %c0_12] : memref<8x1xf32, #tpu.memory_space<vmem>>, vector<8x1xf32>
    tpu.vector_store %arg9[%c0_11, %c0_12], %27 {strides = array<i32>} : memref<8x1xf32, #tpu.memory_space<vmem>>, vector<8x1xf32>,
    %c0_13 = arith.constant 0 : index
    %c0_14 = arith.constant 0 : index
    %29 = vector.load %arg10[%c0_13, %c0_14] : memref<8x2xf32, #tpu.memory_space<vmem>>, vector<8x2xf32>
    %30 = vector.broadcast %19 : vector<8x1xf32> to vector<8x2xf32>
    %31 = arith.mulf %30, %29 : vector<8x2xf32>
    %c0_15 = arith.constant 0 : index
    %c0_16 = arith.constant 0 : index
    %32 = vector.load %arg5[%c0_15, %c0_16] : memref<8x2xf32, #tpu.memory_space<vmem>>, vector<8x2xf32>
    %cst_17 = arith.constant dense<0.000000e+00> : vector<8x2xf32>
    %33 = tpu.matmul %22, %32, %cst_17 {dimension_numbers = #tpu.dot_dimension_numbers<[1], [0], [0], [1], [0, 0, 1, 1], [], []>} : vector<8x8xf32>, vector<8x2xf32>, vector<8x2xf32> -> vector<8x2xf32>
    %34 = arith.addf %31, %33 : vector<8x2xf32>
    %c0_18 = arith.constant 0 : index
    %c0_19 = arith.constant 0 : index
    %35 = vector.load %arg10[%c0_18, %c0_19] : memref<8x2xf32, #tpu.memory_space<vmem>>, vector<8x2xf32>
    tpu.vector_store %arg10[%c0_18, %c0_19], %34 {strides = array<i32>} : memref<8x2xf32, #tpu.memory_space<vmem>>, vector<8x2xf32>,
    %c0_20 = arith.constant 0 : index
    %c0_21 = arith.constant 0 : index
    %36 = vector.load %arg8[%c0_20, %c0_21] : memref<8x1xf32, #tpu.memory_space<vmem>>, vector<8x1xf32>
    tpu.vector_store %arg8[%c0_20, %c0_21], %17 {strides = array<i32>} : memref<8x1xf32, #tpu.memory_space<vmem>>, vector<8x1xf32>,
    %c0_i32_22 = arith.constant 0 : i32
    %37 = arith.cmpi eq, %arg1, %c0_i32_22 : i32
    %38 = arith.extui %37 : i1 to i32
    %c0_i32_23 = arith.constant 0 : i32
    %39 = arith.cmpi ne, %38, %c0_i32_23 : i32
    scf.if %39 {
      %c0_24 = arith.constant 0 : index
      %c0_25 = arith.constant 0 : index
      %40 = vector.load %arg10[%c0_24, %c0_25] : memref<8x2xf32, #tpu.memory_space<vmem>>, vector<8x2xf32>
      %c0_26 = arith.constant 0 : index
      %c0_27 = arith.constant 0 : index
      %41 = vector.load %arg9[%c0_26, %c0_27] : memref<8x1xf32, #tpu.memory_space<vmem>>, vector<8x1xf32>
      %42 = tpu.reciprocal %41 : vector<8x1xf32> -> vector<8x1xf32>
      %43 = vector.broadcast %42 : vector<8x1xf32> to vector<8x2xf32>
      %44 = arith.mulf %40, %43 : vector<8x2xf32>
      %c0_28 = arith.constant 0 : index
      %c0_29 = arith.constant 0 : index
      %45 = vector.load %arg6[%c0_28, %c0_29] : memref<8x2xf32, #tpu.memory_space<vmem>>, vector<8x2xf32>
      tpu.vector_store %arg6[%c0_28, %c0_29], %44 {strides = array<i32>} : memref<8x2xf32, #tpu.memory_space<vmem>>, vector<8x2xf32>,
    } else {
    }
    return
  }
  func.func @transform_0(%arg0: i32, %arg1: i32) -> (i32, i32) {
    %c0_i32 = arith.constant 0 : i32
    %c0_i32_0 = arith.constant 0 : i32
    return %arg0, %c0_i32 : i32, i32
  }
  func.func @transform_1(%arg0: i32, %arg1: i32) -> (i32, i32) {
    %c0_i32 = arith.constant 0 : i32
    %c0_i32_0 = arith.constant 0 : i32
    %c0_i32_1 = arith.constant 0 : i32
    return %c0_i32, %c0_i32_0 : i32, i32
  }
  func.func @transform_2(%arg0: i32, %arg1: i32) -> (i32, i32) {
    %c0_i32 = arith.constant 0 : i32
    %c0_i32_0 = arith.constant 0 : i32
    return %arg1, %c0_i32 : i32, i32
  }
  func.func @transform_3(%arg0: i32, %arg1: i32) -> (i32, i32) {
    %c0_i32 = arith.constant 0 : i32
    %c0_i32_0 = arith.constant 0 : i32
    return %arg1, %c0_i32 : i32, i32
  }
  func.func @transform_4(%arg0: i32, %arg1: i32) -> (i32, i32) {
    %c0_i32 = arith.constant 0 : i32
    %c0_i32_0 = arith.constant 0 : i32
    return %arg0, %c0_i32 : i32, i32
  }
}

</mosaic_0001>

<bundles_post_ra>
// kernel: tpu_custom_call.1
= control target key start
LH: loop header
LB: loop body
LE: loop exit
PB: predicated region body
PF: predicated region fallthrough
CT: control target
= control target key end

     0   :  { %vm27_vm0 = vcmask 1042432   ;;  %vm23_vm1 = vcmask 23552   ;;  %v358_v0 = vmov 0.0   ;;  %vm359_vm2 = vmmov 0   ;;  %s415_s1 = inlined_call_operand.vmem [shape: f32[3,2], index: 1, kind: input, shape index: {}]   ;;  %s416_s0 = inlined_call_operand.vmem [shape: f32[8,3], index: 0, kind: input, shape index: {}]   ;;  %s417_s2 = inlined_call_operand.vmem [shape: f32[8,2], index: 2, kind: input, shape index: {}]   ;;  %s418_s3 = inlined_call_operand.vmem [shape: f32[8,2], index: 3, kind: input, shape index: {}]   ;;  %s419_s4 = inlined_call_operand.vmem [shape: f32[8,2], index: 4, kind: output, shape index: {}]  }
   0x1   :  { %331 = vmatprep.subr.mxu0 %v358_v0  ;;  %v22_v1 = vld [vmem:[%s415_s1] sm:$0x7]  ;;  %333 = vmatprep.mubr.msk.f32.mxu0 %vm359_vm2, %v358_v0  ;;  %vm102_vm3 = vcmask 15360   ;;  %vm104_vm4 = vcmask 7168   ;;  %v360_v8 = vmov -inf   ;;  %v188_v9 = vlaneseq }
   0x2   :  { %v21_v2 = vld [vmem:[%s416_s0] sm:$0xff]  ;;  %332 = vmatpush3.msk.msra.mxu0 %vm27_vm0, %v22_v1  ;;  %336 = vmatprep.subr.mxu1 %v358_v0  ;;  %107 = vst.msk [vmem:[#allocation5] sm:$0xff] %vm102_vm3, %v358_v0  ;;  %vm195_vm6 = vcmask 64512   ;;  %v361_v15 = vmov 0  }
   0x3   :  { %334 = vmatmul.mubr.msk.f32.vlgmr.msra.gmra.mxu0 %vm23_vm1, %v21_v2  ;;  %338 = vmatprep.mubr.msk.f32.mxu1 %vm359_vm2, %v358_v0  ;;  %v109_v3 = vld [vmem:[%s417_s2] sm:$0xff]  ;;  %105 = vst.msk [vmem:[#allocation3] sm:$0xff] %vm104_vm4, %v360_v8  ;;  %106 = vst.msk [vmem:[#allocation4] sm:$0xff] %vm104_vm4, %v358_v0  ;;  %v189_v10 = vand.u32 127, %v188_v9 }
   0x4   :  { %341 = vmatprep.subr.mxu0 %v358_v0  ;;  %343 = vmatprep.mubr.msk.f32.mxu0 %vm359_vm2, %v358_v0  ;;  %v226_v20 = vld [vmem:[%s418_s3] sm:$0xff] }
   0x5   :  { %337 = vmatpush3.xpose.msk.msra.mxu1 %vm102_vm3, %v109_v3  ;;  %vm192_vm5 = vcmp.lt.s32.totalorder %v189_v10, 6  ;;  %350 = vset.pattern.permute.xlu0 %v361_v15 }
   0x6   :  { %351 = vset.pattern.permute.xlu1 %v361_v15  ;;  %342 = vmatpush3.msra.mxu0 %v226_v20 }
   0x9   :  { %v219_v34 = vld [vmem:[#allocation5] sm:$0xff] }
   0xa   :  { %v194_v16 = vld [vmem:[#allocation3] sm:$0xff]  ;;  %v211_v28 = vld [vmem:[#allocation4] sm:$0xff] }
  0xc3   :  { %v97_v4 = vpop.f32.mrf.mxu0 }
  0xc4   :  { %v101_v5 = vmul.f32 0.70710677, %v97_v4 }
  0xc5   :  { %v335_v6 = vpop.f32.mrf.mxu0 }
  0xc6   :  { %103 = vst.msk [vmem:[#allocation2] sm:$0xff] %vm102_vm3, %v101_v5 }
  0xcd   :  { %v108_v7 = vld [vmem:[#allocation2] sm:$0xff] }
  0xce   :  { %339 = vmatmul.mubr.msk.f32.vlgmr.msra.gmra.mxu1 %vm102_vm3, %v108_v7 }
 0x18e   :  { %v183_v11 = vpop.f32.mrf.mxu1 }
 0x18f   :  { %v193_v12 = vsel %vm192_vm5, %v183_v11, -1e+30 }
 0x190   :  { %v340_v13 = vpop.f32.mrf.mxu1  ;;  %v196_v14 = vsel %vm195_vm6, %v193_v12, -inf }
 0x191   :  { %197 = vmax.xlane.f32.xlu0 %v196_v14 }
 0x21a   :  { %v198_v17 = vpop.xlane.xlu0 %197 }
 0x21b   :  { %v199_v18 = vmax.f32 %v194_v16, %v198_v17 }
 0x21d   :  { %v200_v19 = vsub.f32 %v194_v16, %v199_v18  ;;  %302 = vst.msk [vmem:[#allocation3] sm:$0xff] %vm104_vm4, %v199_v18  ;;  %205 = vperm.xlu0 %350, %v199_v18  }
 0x21f   :  { %v201_v25 = vmul.f32 1.442695, %v200_v19 }
 0x298   :  { %v206_v21 = vpop.permute.xlu0 %205 }
 0x299   :  { %v208_v22 = vsub.f32 %v193_v12, %v206_v21 }
 0x29b   :  { %v209_v23 = vmul.f32 1.442695, %v208_v22 }
 0x29d   :  { %352 = vpow2.f32 %v209_v23 }
 0x29e   :  { %354 = vpow2.f32 %v201_v25 }
 0x2aa   :  { %v353_v24 = vpop.eup %352 }
 0x2ab   :  { %344 = vmatmul.mubr.msk.f32.vlgmr.msra.gmra.mxu0 %vm195_vm6, %v353_v24  ;;  %v213_v26 = vsel %vm195_vm6, %v353_v24, 0.0  ;;  %v355_v27 = vpop.eup %354 }
 0x2ac   :  { %214 = vadd.xlane.f32.xlu1 %v213_v26  ;;  %v212_v29 = vmul.f32 %v355_v27, %v211_v28 }
 0x2bd   :  { %222 = vperm.xlu1 %351, %v355_v27  }
 0x335   :  { %v215_v30 = vpop.xlane.xlu1 %214 }
 0x336   :  { %v216_v31 = vadd.f32 %v215_v30, %v212_v29 }
 0x338   :  { %218 = vst.msk [vmem:[#allocation4] sm:$0xff] %vm104_vm4, %v216_v31 }
 0x339   :  { %v223_v35 = vpop.permute.xlu1 %222 }
 0x33a   :  { %v225_v36 = vmul.f32 %v223_v35, %v219_v34 }
 0x33f   :  { %v307_v32 = vld [vmem:[#allocation4] sm:$0xff] }
 0x340   :  { %356 = vrcp.f32 %v307_v32 }
 0x34d   :  { %v357_v33 = vpop.eup %356 }
 0x34e   :  { %311 = vperm.xlu1 %351, %v357_v33  }
 0x36b   :  { %v296_v37 = vpop.f32.mrf.mxu0 }
 0x36c   :  { %v300_v38 = vadd.f32 %v296_v37, %v225_v36 }
 0x36d   :  { %v345_v39 = vpop.f32.mrf.mxu0 }
 0x36e   :  { %301 = vst.msk [vmem:[#allocation5] sm:$0xff] %vm102_vm3, %v300_v38 }
 0x375   :  { %v306_v41 = vld [vmem:[#allocation5] sm:$0xff] }
 0x3c9   :  { %v312_v40 = vpop.permute.xlu1 %311 }
 0x3ca   :  { %v314_v42 = vmul.f32 %v312_v40, %v306_v41 }
 0x3cc   :  { %315 = vst.msk [vmem:[%s419_s4] sm:$0xff] %vm102_vm3, %v314_v42 }

</bundles_post_ra>
